<compile_context>
chip_gen: v7x
topology: tpu7x:2x2x1
jax: 0.10.0
libtpu: 0.0.40
codegen_flags: <defaults>
</compile_context>

<pallas_src>
import functools
import numpy as np
import jax
import jax.numpy as jnp
from jax import lax
from jax.experimental import pallas as pl
from jax.experimental.pallas import tpu as pltpu

LN_EPS = 1e-5  # nn.LayerNorm default eps


def _layer_norm(x, gamma, beta, eps=LN_EPS):
    # x: (N, D); gamma/beta: (1, D).  Biased variance, matching nn.LayerNorm.
    mean = jnp.mean(x, axis=-1, keepdims=True)
    xc = x - mean
    var = jnp.mean(xc * xc, axis=-1, keepdims=True)
    return xc * lax.rsqrt(var + eps) * gamma + beta


def _gelu(x):
    # TODO(synk): PyTorch F.gelu default is the exact erf-based GELU; the tanh
    # approximation is used here (max abs deviation ~1e-3) since erf has no
    # guaranteed Mosaic lowering inside Pallas kernels.
    c = 0.7978845608028654  # sqrt(2/pi)
    return 0.5 * x * (1.0 + jnp.tanh(c * (x + 0.044715 * x * x * x)))


def _make_transformer_layer_kernel(B, S, D, Dadj, H, HID):
    hd = Dadj // H
    N = B * S
    inv_sqrt_hd = 1.0 / float(np.sqrt(hd))

    def kernel(x_ref, wqkv_ref, bqkv_ref, wo_ref, bo_ref,
               w1_ref, b1_ref, w2_ref, b2_ref,
               g1_ref, be1_ref, g2_ref, be2_ref, o_ref):
        x = x_ref[...].astype(jnp.float32)                 # (N, D), N = B*S

        wqkv = wqkv_ref[...]                               # (D, 3*Dadj)
        mdt = wqkv.dtype                                   # matmul operand dtype
        cast = lambda a: a.astype(mdt)                     # no-op when mdt == f32

        # ----- Self-attention block (pre-LN) ------------------------------
        xn = _layer_norm(x, g1_ref[...], be1_ref[...])
        # Fused Q/K/V projection: one (N, D) @ (D, 3*Dadj) matmul.
        qkv = jnp.dot(cast(xn), wqkv,
                      preferred_element_type=jnp.float32) + bqkv_ref[...]

        # Stack heads on a leading batch axis: (H*B, S, hd), index n = h*B + b.
        # Head/batch split of rows is a trivial leading-dim reshape; the hd-wide
        # lane slices happen once here instead of inside a per-head compute loop.
        def to_heads(base):
            return jnp.concatenate(
                [qkv[:, base + h * hd: base + (h + 1) * hd].reshape(B, S, hd)
                 for h in range(H)], axis=0)

        q = to_heads(0)
        k = to_heads(Dadj)
        v = to_heads(2 * Dadj)

        # Batched scores + softmax for ALL (head, batch) pairs at once.
        s = jnp.einsum('nqd,nkd->nqk', cast(q), cast(k),
                       preferred_element_type=jnp.float32) * inv_sqrt_hd
        s = s - jnp.max(s, axis=-1, keepdims=True)
        p = jnp.exp(s)
        # EUP reciprocal instead of a VALU divide.
        p = p * pl.reciprocal(jnp.sum(p, axis=-1, keepdims=True), approx=True)
        # TODO(synk): dropout on attention weights is identity in eval mode.
        ctx = jnp.einsum('nqk,nkd->nqd', cast(p), cast(v),
                         preferred_element_type=jnp.float32)   # (H*B, S, hd)

        # Re-assemble heads on the lane axis -> (N, Dadj), matching PyTorch's
        # transpose(1,2).view(B,S,Dadj), then ONE output projection (K = Dadj).
        ctx_all = jnp.concatenate(
            [ctx[h * B:(h + 1) * B].reshape(N, hd) for h in range(H)], axis=1)
        att = jnp.dot(cast(ctx_all), wo_ref[...],
                      preferred_element_type=jnp.float32)
        x1 = att + bo_ref[...] + x                         # residual

        # ----- Feed-forward block (pre-LN) --------------------------------
        xn2 = _layer_norm(x1, g2_ref[...], be2_ref[...])
        hmid = jnp.dot(cast(xn2), w1_ref[...],
                       preferred_element_type=jnp.float32) + b1_ref[...]
        hmid = _gelu(hmid)
        # TODO(synk): dropout after GELU is identity in eval mode.
        y = jnp.dot(cast(hmid), w2_ref[...],
                    preferred_element_type=jnp.float32) + b2_ref[...] + x1

        # NOTE: D=32 < 128 lanes -> masked store; at these sizes the store is
        # ~2 KB and a lane-dense reshape inside the kernel would cost more than
        # it saves.  Revisit (pad D / reshape to (B, S*D)) for large D.
        o_ref[...] = y.astype(o_ref.dtype)

    return kernel


def transformer_layer(x, params, num_heads=4, matmul_dtype=jnp.float32):
    # x: (B, S, D) -> (B, S, D).  Batch is folded into rows: one grid step.
    B, S, D = x.shape
    N = B * S
    Dadj = params["wqkv"].shape[1] // 3
    HID = params["w1"].shape[1]
    hd = Dadj // num_heads
    kern = _make_transformer_layer_kernel(B, S, D, Dadj, num_heads, HID)

    # Matmul weight operands may be bf16 (v6e/v7x); biases / LN params stay f32.
    wqkv = params["wqkv"].astype(matmul_dtype)
    wo = params["wo"].astype(matmul_dtype)
    w1 = params["w1"].astype(matmul_dtype)
    w2 = params["w2"].astype(matmul_dtype)

    x2 = x.reshape(N, D)
    args = (x2, wqkv, params["bqkv"], wo, params["bo"],
            w1, params["b1"], w2, params["b2"],
            params["g1"], params["be1"], params["g2"], params["be2"])

    in_specs = [pl.BlockSpec(a.shape, lambda i: (0, 0)) for a in args]

    # Advisory cost estimate (helps XLA schedule around this latency-bound call).
    flops = (2 * N * D * 3 * Dadj                 # fused QKV projection
             + 2 * 2 * (B * num_heads) * S * S * hd   # scores + context
             + 2 * N * Dadj * D                   # output projection
             + 2 * N * D * HID + 2 * N * HID * D)  # FFN
    transcendentals = B * num_heads * S * S + N * HID
    bytes_accessed = int(sum(int(np.prod(a.shape)) * a.dtype.itemsize for a in args)
                         + N * D * x.dtype.itemsize)

    out = pl.pallas_call(
        kern,
        out_shape=jax.ShapeDtypeStruct((N, D), x.dtype),
        grid=(1,),
        in_specs=in_specs,
        out_specs=pl.BlockSpec((N, D), lambda i: (0, 0)),
        compiler_params=pltpu.CompilerParams(
            dimension_semantics=("arbitrary",)),
        cost_estimate=pl.CostEstimate(flops=flops,
                                      transcendentals=transcendentals,
                                      bytes_accessed=bytes_accessed),
    )(*args)
    return out.reshape(B, S, D)


def init_params(key, feature_dim=32, hidden_dim=64, num_heads=4):
    if feature_dim % num_heads != 0:
        adjusted = (feature_dim // num_heads + 1) * num_heads
    else:
        adjusted = feature_dim
    keys = iter(jax.random.split(key, 16))

    def linear(cin, cout):
        w = jax.random.normal(next(keys), (cin, cout), jnp.float32) / np.sqrt(cin)
        b = 0.05 * jax.random.normal(next(keys), (cout,), jnp.float32)
        return w, b

    wq, bq = linear(feature_dim, adjusted)
    wk, bk = linear(feature_dim, adjusted)
    wv, bv = linear(feature_dim, adjusted)
    wo, bo = linear(adjusted, feature_dim)
    w1, b1 = linear(feature_dim, hidden_dim)
    w2, b2 = linear(hidden_dim, feature_dim)
    return dict(
        wqkv=jnp.concatenate([wq, wk, wv], axis=1),            # fused QKV weights
        bqkv=jnp.concatenate([bq, bk, bv]).reshape(1, 3 * adjusted),
        wo=wo, bo=bo.reshape(1, feature_dim),
        w1=w1, b1=b1.reshape(1, hidden_dim),
        w2=w2, b2=b2.reshape(1, feature_dim),
        g1=jnp.ones((1, feature_dim), jnp.float32),
        be1=jnp.zeros((1, feature_dim), jnp.float32),
        g2=jnp.ones((1, feature_dim), jnp.float32),
        be2=jnp.zeros((1, feature_dim), jnp.float32),
    )


if __name__ == "__main__":
    key = jax.random.PRNGKey(0)
    pkey, xkey = jax.random.split(key)
    B, S, D, HID, H = 2, 8, 32, 64, 4
    params = init_params(pkey, feature_dim=D, hidden_dim=HID, num_heads=H)
    x = jax.random.normal(xkey, (B, S, D), jnp.float32)

    fwd = jax.jit(functools.partial(transformer_layer, num_heads=H))
    out = fwd(x, params)
    out = jax.block_until_ready(out)
    assert out.shape == (B, S, D), out.shape
    assert bool(jnp.all(jnp.isfinite(out)))
    print("KERNEL_OK")
</pallas_src>

<mosaic_0001>
module attributes {stable_mosaic.version = 11 : i64} {
  func.func @kernel(%arg0: i32, %arg1: memref<16x32xf32, #tpu.memory_space<vmem>>, %arg2: memref<32x96xf32, #tpu.memory_space<vmem>>, %arg3: memref<1x96xf32, #tpu.memory_space<vmem>>, %arg4: memref<32x32xf32, #tpu.memory_space<vmem>>, %arg5: memref<1x32xf32, #tpu.memory_space<vmem>>, %arg6: memref<32x64xf32, #tpu.memory_space<vmem>>, %arg7: memref<1x64xf32, #tpu.memory_space<vmem>>, %arg8: memref<64x32xf32, #tpu.memory_space<vmem>>, %arg9: memref<1x32xf32, #tpu.memory_space<vmem>>, %arg10: memref<1x32xf32, #tpu.memory_space<vmem>>, %arg11: memref<1x32xf32, #tpu.memory_space<vmem>>, %arg12: memref<1x32xf32, #tpu.memory_space<vmem>>, %arg13: memref<1x32xf32, #tpu.memory_space<vmem>>, %arg14: memref<16x32xf32, #tpu.memory_space<vmem>>) attributes {dimension_semantics = [#tpu.dimension_semantics<arbitrary>], iteration_bounds = array<i64: 1>, scalar_prefetch = 0 : i64, scratch_operands = 0 : i64, tpu.core_type = #tpu.core_type<tc>, window_params = [{pipeline_mode = #tpu.pipeline_mode<synchronous>, transform_indices = @transform_0, window_bounds = array<i64: 16, 32>}, {pipeline_mode = #tpu.pipeline_mode<synchronous>, transform_indices = @transform_1, window_bounds = array<i64: 32, 96>}, {pipeline_mode = #tpu.pipeline_mode<synchronous>, transform_indices = @transform_2, window_bounds = array<i64: 1, 96>}, {pipeline_mode = #tpu.pipeline_mode<synchronous>, transform_indices = @transform_3, window_bounds = array<i64: 32, 32>}, {pipeline_mode = #tpu.pipeline_mode<synchronous>, transform_indices = @transform_4, window_bounds = array<i64: 1, 32>}, {pipeline_mode = #tpu.pipeline_mode<synchronous>, transform_indices = @transform_5, window_bounds = array<i64: 32, 64>}, {pipeline_mode = #tpu.pipeline_mode<synchronous>, transform_indices = @transform_6, window_bounds = array<i64: 1, 64>}, {pipeline_mode = #tpu.pipeline_mode<synchronous>, transform_indices = @transform_7, window_bounds = array<i64: 64, 32>}, {pipeline_mode = #tpu.pipeline_mode<synchronous>, transform_indices = @transform_8, window_bounds = array<i64: 1, 32>}, {pipeline_mode = #tpu.pipeline_mode<synchronous>, transform_indices = @transform_9, window_bounds = array<i64: 1, 32>}, {pipeline_mode = #tpu.pipeline_mode<synchronous>, transform_indices = @transform_10, window_bounds = array<i64: 1, 32>}, {pipeline_mode = #tpu.pipeline_mode<synchronous>, transform_indices = @transform_11, window_bounds = array<i64: 1, 32>}, {pipeline_mode = #tpu.pipeline_mode<synchronous>, transform_indices = @transform_12, window_bounds = array<i64: 1, 32>}, {pipeline_mode = #tpu.pipeline_mode<synchronous>, transform_indices = @transform_13, window_bounds = array<i64: 16, 32>}]} {
    %c0 = arith.constant 0 : index
    %c0_0 = arith.constant 0 : index
    %0 = vector.load %arg1[%c0, %c0_0] : memref<16x32xf32, #tpu.memory_space<vmem>>, vector<16x32xf32>
    %c0_1 = arith.constant 0 : index
    %c0_2 = arith.constant 0 : index
    %1 = vector.load %arg2[%c0_1, %c0_2] : memref<32x96xf32, #tpu.memory_space<vmem>>, vector<32x96xf32>
    %c0_3 = arith.constant 0 : index
    %c0_4 = arith.constant 0 : index
    %2 = vector.load %arg10[%c0_3, %c0_4] : memref<1x32xf32, #tpu.memory_space<vmem>>, vector<1x32xf32>
    %c0_5 = arith.constant 0 : index
    %c0_6 = arith.constant 0 : index
    %3 = vector.load %arg11[%c0_5, %c0_6] : memref<1x32xf32, #tpu.memory_space<vmem>>, vector<1x32xf32>
    %cst = arith.constant dense<0.000000e+00> : vector<16xf32>
    %4 = vector.multi_reduction <add>, %0, %cst [1] : vector<16x32xf32> to vector<16xf32>
    %5 = vector.shape_cast %4 : vector<16xf32> to vector<16x1xf32>
    %cst_7 = arith.constant 3.200000e+01 : f32
    %6 = vector.broadcast %cst_7 : f32 to vector<16x1xf32>
    %7 = arith.divf %5, %6 : vector<16x1xf32>
    %8 = vector.broadcast %7 : vector<16x1xf32> to vector<16x32xf32>
    %9 = arith.subf %0, %8 : vector<16x32xf32>
    %10 = arith.mulf %9, %9 : vector<16x32xf32>
    %cst_8 = arith.constant dense<0.000000e+00> : vector<16xf32>
    %11 = vector.multi_reduction <add>, %10, %cst_8 [1] : vector<16x32xf32> to vector<16xf32>
    %12 = vector.shape_cast %11 : vector<16xf32> to vector<16x1xf32>
    %cst_9 = arith.constant 3.200000e+01 : f32
    %13 = vector.broadcast %cst_9 : f32 to vector<16x1xf32>
    %14 = arith.divf %12, %13 : vector<16x1xf32>
    %cst_10 = arith.constant 9.99999974E-6 : f32
    %15 = vector.broadcast %cst_10 : f32 to vector<16x1xf32>
    %16 = arith.addf %14, %15 : vector<16x1xf32>
    %17 = math.rsqrt %16 : vector<16x1xf32>
    %18 = vector.broadcast %17 : vector<16x1xf32> to vector<16x32xf32>
    %19 = arith.mulf %9, %18 : vector<16x32xf32>
    %20 = vector.broadcast %2 : vector<1x32xf32> to vector<16x32xf32>
    %21 = arith.mulf %19, %20 : vector<16x32xf32>
    %22 = vector.broadcast %3 : vector<1x32xf32> to vector<16x32xf32>
    %23 = arith.addf %21, %22 : vector<16x32xf32>
    %cst_11 = arith.constant dense<0.000000e+00> : vector<16x96xf32>
    %24 = tpu.matmul %23, %1, %cst_11 {dimension_numbers = #tpu.dot_dimension_numbers<[1], [0], [0], [1], [0, 0, 1, 1], [], []>} : vector<16x32xf32>, vector<32x96xf32>, vector<16x96xf32> -> vector<16x96xf32>
    %c0_12 = arith.constant 0 : index
    %c0_13 = arith.constant 0 : index
    %25 = vector.load %arg3[%c0_12, %c0_13] : memref<1x96xf32, #tpu.memory_space<vmem>>, vector<1x96xf32>
    %26 = vector.broadcast %25 : vector<1x96xf32> to vector<16x96xf32>
    %27 = arith.addf %24, %26 : vector<16x96xf32>
    %28 = vector.extract_strided_slice %27 {offsets = [0, 0], sizes = [16, 8], strides = [1, 1]} : vector<16x96xf32> to vector<16x8xf32>
    %29 = vector.shape_cast %28 : vector<16x8xf32> to vector<2x8x8xf32>
    %30 = vector.extract_strided_slice %27 {offsets = [0, 8], sizes = [16, 8], strides = [1, 1]} : vector<16x96xf32> to vector<16x8xf32>
    %31 = vector.shape_cast %30 : vector<16x8xf32> to vector<2x8x8xf32>
    %32 = vector.extract_strided_slice %27 {offsets = [0, 16], sizes = [16, 8], strides = [1, 1]} : vector<16x96xf32> to vector<16x8xf32>
    %33 = vector.shape_cast %32 : vector<16x8xf32> to vector<2x8x8xf32>
    %34 = vector.extract_strided_slice %27 {offsets = [0, 24], sizes = [16, 8], strides = [1, 1]} : vector<16x96xf32> to vector<16x8xf32>
    %35 = vector.shape_cast %34 : vector<16x8xf32> to vector<2x8x8xf32>
    %36 = tpu.concatenate %29, %31, %33, %35 in 0 : vector<2x8x8xf32>, vector<2x8x8xf32>, vector<2x8x8xf32>, vector<2x8x8xf32> -> vector<8x8x8xf32>
    %37 = vector.extract_strided_slice %27 {offsets = [0, 32], sizes = [16, 8], strides = [1, 1]} : vector<16x96xf32> to vector<16x8xf32>
    %38 = vector.shape_cast %37 : vector<16x8xf32> to vector<2x8x8xf32>
    %39 = vector.extract_strided_slice %27 {offsets = [0, 40], sizes = [16, 8], strides = [1, 1]} : vector<16x96xf32> to vector<16x8xf32>
    %40 = vector.shape_cast %39 : vector<16x8xf32> to vector<2x8x8xf32>
    %41 = vector.extract_strided_slice %27 {offsets = [0, 48], sizes = [16, 8], strides = [1, 1]} : vector<16x96xf32> to vector<16x8xf32>
    %42 = vector.shape_cast %41 : vector<16x8xf32> to vector<2x8x8xf32>
    %43 = vector.extract_strided_slice %27 {offsets = [0, 56], sizes = [16, 8], strides = [1, 1]} : vector<16x96xf32> to vector<16x8xf32>
    %44 = vector.shape_cast %43 : vector<16x8xf32> to vector<2x8x8xf32>
    %45 = tpu.concatenate %38, %40, %42, %44 in 0 : vector<2x8x8xf32>, vector<2x8x8xf32>, vector<2x8x8xf32>, vector<2x8x8xf32> -> vector<8x8x8xf32>
    %46 = vector.extract_strided_slice %27 {offsets = [0, 64], sizes = [16, 8], strides = [1, 1]} : vector<16x96xf32> to vector<16x8xf32>
    %47 = vector.shape_cast %46 : vector<16x8xf32> to vector<2x8x8xf32>
    %48 = vector.extract_strided_slice %27 {offsets = [0, 72], sizes = [16, 8], strides = [1, 1]} : vector<16x96xf32> to vector<16x8xf32>
    %49 = vector.shape_cast %48 : vector<16x8xf32> to vector<2x8x8xf32>
    %50 = vector.extract_strided_slice %27 {offsets = [0, 80], sizes = [16, 8], strides = [1, 1]} : vector<16x96xf32> to vector<16x8xf32>
    %51 = vector.shape_cast %50 : vector<16x8xf32> to vector<2x8x8xf32>
    %52 = vector.extract_strided_slice %27 {offsets = [0, 88], sizes = [16, 8], strides = [1, 1]} : vector<16x96xf32> to vector<16x8xf32>
    %53 = vector.shape_cast %52 : vector<16x8xf32> to vector<2x8x8xf32>
    %54 = tpu.concatenate %47, %49, %51, %53 in 0 : vector<2x8x8xf32>, vector<2x8x8xf32>, vector<2x8x8xf32>, vector<2x8x8xf32> -> vector<8x8x8xf32>
    "tpu.trace_start"() <{level = 10 : i32, message = "nqd,nkd->nqk"}> : () -> ()
    %cst_14 = arith.constant dense<0.000000e+00> : vector<8x8x8xf32>
    %55 = tpu.matmul %36, %45, %cst_14 {dimension_numbers = #tpu.dot_dimension_numbers<[2], [2], [1], [1], [0, 0, 0, 1, 1, 1], [0], [0]>} : vector<8x8x8xf32>, vector<8x8x8xf32>, vector<8x8x8xf32> -> vector<8x8x8xf32>
    "tpu.trace_stop"() : () -> ()
    %cst_15 = arith.constant 0.353553385 : f32
    %56 = vector.broadcast %cst_15 : f32 to vector<8x8x8xf32>
    %57 = arith.mulf %55, %56 : vector<8x8x8xf32>
    %cst_16 = arith.constant dense<0xFF800000> : vector<8x8xf32>
    %58 = vector.multi_reduction <maximumf>, %57, %cst_16 [2] : vector<8x8x8xf32> to vector<8x8xf32>
    %59 = vector.shape_cast %58 : vector<8x8xf32> to vector<8x8x1xf32>
    %60 = vector.broadcast %59 : vector<8x8x1xf32> to vector<8x8x8xf32>
    %61 = arith.subf %57, %60 : vector<8x8x8xf32>
    %62 = math.exp %61 : vector<8x8x8xf32>
    %cst_17 = arith.constant dense<0.000000e+00> : vector<8x8xf32>
    %63 = vector.multi_reduction <add>, %62, %cst_17 [2] : vector<8x8x8xf32> to vector<8x8xf32>
    %64 = vector.shape_cast %63 : vector<8x8xf32> to vector<8x8x1xf32>
    %65 = tpu.reciprocal %64 {approx = true} : vector<8x8x1xf32> -> vector<8x8x1xf32>
    %66 = vector.broadcast %65 : vector<8x8x1xf32> to vector<8x8x8xf32>
    %67 = arith.mulf %62, %66 : vector<8x8x8xf32>
    "tpu.trace_start"() <{level = 10 : i32, message = "nqk,nkd->nqd"}> : () -> ()
    %cst_18 = arith.constant dense<0.000000e+00> : vector<8x8x8xf32>
    %68 = tpu.matmul %67, %54, %cst_18 {dimension_numbers = #tpu.dot_dimension_numbers<[2], [1], [1], [2], [0, 0, 0, 1, 1, 2], [0], [0]>} : vector<8x8x8xf32>, vector<8x8x8xf32>, vector<8x8x8xf32> -> vector<8x8x8xf32>
    "tpu.trace_stop"() : () -> ()
    %69 = vector.extract_strided_slice %68 {offsets = [0, 0, 0], sizes = [2, 8, 8], strides = [1, 1, 1]} : vector<8x8x8xf32> to vector<2x8x8xf32>
    %70 = vector.shape_cast %69 : vector<2x8x8xf32> to vector<16x8xf32>
    %71 = vector.extract_strided_slice %68 {offsets = [2, 0, 0], sizes = [2, 8, 8], strides = [1, 1, 1]} : vector<8x8x8xf32> to vector<2x8x8xf32>
    %72 = vector.shape_cast %71 : vector<2x8x8xf32> to vector<16x8xf32>
    %73 = vector.extract_strided_slice %68 {offsets = [4, 0, 0], sizes = [2, 8, 8], strides = [1, 1, 1]} : vector<8x8x8xf32> to vector<2x8x8xf32>
    %74 = vector.shape_cast %73 : vector<2x8x8xf32> to vector<16x8xf32>
    %75 = vector.extract_strided_slice %68 {offsets = [6, 0, 0], sizes = [2, 8, 8], strides = [1, 1, 1]} : vector<8x8x8xf32> to vector<2x8x8xf32>
    %76 = vector.shape_cast %75 : vector<2x8x8xf32> to vector<16x8xf32>
    %77 = tpu.concatenate %70, %72, %74, %76 in 1 : vector<16x8xf32>, vector<16x8xf32>, vector<16x8xf32>, vector<16x8xf32> -> vector<16x32xf32>
    %c0_19 = arith.constant 0 : index
    %c0_20 = arith.constant 0 : index
    %78 = vector.load %arg4[%c0_19, %c0_20] : memref<32x32xf32, #tpu.memory_space<vmem>>, vector<32x32xf32>
    %cst_21 = arith.constant dense<0.000000e+00> : vector<16x32xf32>
    %79 = tpu.matmul %77, %78, %cst_21 {dimension_numbers = #tpu.dot_dimension_numbers<[1], [0], [0], [1], [0, 0, 1, 1], [], []>} : vector<16x32xf32>, vector<32x32xf32>, vector<16x32xf32> -> vector<16x32xf32>
    %c0_22 = arith.constant 0 : index
    %c0_23 = arith.constant 0 : index
    %80 = vector.load %arg5[%c0_22, %c0_23] : memref<1x32xf32, #tpu.memory_space<vmem>>, vector<1x32xf32>
    %81 = vector.broadcast %80 : vector<1x32xf32> to vector<16x32xf32>
    %82 = arith.addf %79, %81 : vector<16x32xf32>
    %83 = arith.addf %82, %0 : vector<16x32xf32>
    %c0_24 = arith.constant 0 : index
    %c0_25 = arith.constant 0 : index
    %84 = vector.load %arg12[%c0_24, %c0_25] : memref<1x32xf32, #tpu.memory_space<vmem>>, vector<1x32xf32>
    %c0_26 = arith.constant 0 : index
    %c0_27 = arith.constant 0 : index
    %85 = vector.load %arg13[%c0_26, %c0_27] : memref<1x32xf32, #tpu.memory_space<vmem>>, vector<1x32xf32>
    %cst_28 = arith.constant dense<0.000000e+00> : vector<16xf32>
    %86 = vector.multi_reduction <add>, %83, %cst_28 [1] : vector<16x32xf32> to vector<16xf32>
    %87 = vector.shape_cast %86 : vector<16xf32> to vector<16x1xf32>
    %cst_29 = arith.constant 3.200000e+01 : f32
    %88 = vector.broadcast %cst_29 : f32 to vector<16x1xf32>
    %89 = arith.divf %87, %88 : vector<16x1xf32>
    %90 = vector.broadcast %89 : vector<16x1xf32> to vector<16x32xf32>
    %91 = arith.subf %83, %90 : vector<16x32xf32>
    %92 = arith.mulf %91, %91 : vector<16x32xf32>
    %cst_30 = arith.constant dense<0.000000e+00> : vector<16xf32>
    %93 = vector.multi_reduction <add>, %92, %cst_30 [1] : vector<16x32xf32> to vector<16xf32>
    %94 = vector.shape_cast %93 : vector<16xf32> to vector<16x1xf32>
    %cst_31 = arith.constant 3.200000e+01 : f32
    %95 = vector.broadcast %cst_31 : f32 to vector<16x1xf32>
    %96 = arith.divf %94, %95 : vector<16x1xf32>
    %cst_32 = arith.constant 9.99999974E-6 : f32
    %97 = vector.broadcast %cst_32 : f32 to vector<16x1xf32>
    %98 = arith.addf %96, %97 : vector<16x1xf32>
    %99 = math.rsqrt %98 : vector<16x1xf32>
    %100 = vector.broadcast %99 : vector<16x1xf32> to vector<16x32xf32>
    %101 = arith.mulf %91, %100 : vector<16x32xf32>
    %102 = vector.broadcast %84 : vector<1x32xf32> to vector<16x32xf32>
    %103 = arith.mulf %101, %102 : vector<16x32xf32>
    %104 = vector.broadcast %85 : vector<1x32xf32> to vector<16x32xf32>
    %105 = arith.addf %103, %104 : vector<16x32xf32>
    %c0_33 = arith.constant 0 : index
    %c0_34 = arith.constant 0 : index
    %106 = vector.load %arg6[%c0_33, %c0_34] : memref<32x64xf32, #tpu.memory_space<vmem>>, vector<32x64xf32>
    %cst_35 = arith.constant dense<0.000000e+00> : vector<16x64xf32>
    %107 = tpu.matmul %105, %106, %cst_35 {dimension_numbers = #tpu.dot_dimension_numbers<[1], [0], [0], [1], [0, 0, 1, 1], [], []>} : vector<16x32xf32>, vector<32x64xf32>, vector<16x64xf32> -> vector<16x64xf32>
    %c0_36 = arith.constant 0 : index
    %c0_37 = arith.constant 0 : index
    %108 = vector.load %arg7[%c0_36, %c0_37] : memref<1x64xf32, #tpu.memory_space<vmem>>, vector<1x64xf32>
    %109 = vector.broadcast %108 : vector<1x64xf32> to vector<16x64xf32>
    %110 = arith.addf %107, %109 : vector<16x64xf32>
    %cst_38 = arith.constant 5.000000e-01 : f32
    %111 = vector.broadcast %cst_38 : f32 to vector<16x64xf32>
    %112 = arith.mulf %111, %110 : vector<16x64xf32>
    %cst_39 = arith.constant 4.471500e-02 : f32
    %113 = vector.broadcast %cst_39 : f32 to vector<16x64xf32>
    %114 = arith.mulf %113, %110 : vector<16x64xf32>
    %115 = arith.mulf %114, %110 : vector<16x64xf32>
    %116 = arith.mulf %115, %110 : vector<16x64xf32>
    %117 = arith.addf %110, %116 : vector<16x64xf32>
    %cst_40 = arith.constant 0.797884583 : f32
    %118 = vector.broadcast %cst_40 : f32 to vector<16x64xf32>
    %119 = arith.mulf %118, %117 : vector<16x64xf32>
    %120 = math.tanh %119 : vector<16x64xf32>
    %cst_41 = arith.constant 1.000000e+00 : f32
    %121 = vector.broadcast %cst_41 : f32 to vector<16x64xf32>
    %122 = arith.addf %121, %120 : vector<16x64xf32>
    %123 = arith.mulf %112, %122 : vector<16x64xf32>
    %c0_42 = arith.constant 0 : index
    %c0_43 = arith.constant 0 : index
    %124 = vector.load %arg8[%c0_42, %c0_43] : memref<64x32xf32, #tpu.memory_space<vmem>>, vector<64x32xf32>
    %cst_44 = arith.constant dense<0.000000e+00> : vector<16x32xf32>
    %125 = tpu.matmul %123, %124, %cst_44 {dimension_numbers = #tpu.dot_dimension_numbers<[1], [0], [0], [1], [0, 0, 1, 1], [], []>} : vector<16x64xf32>, vector<64x32xf32>, vector<16x32xf32> -> vector<16x32xf32>
    %c0_45 = arith.constant 0 : index
    %c0_46 = arith.constant 0 : index
    %126 = vector.load %arg9[%c0_45, %c0_46] : memref<1x32xf32, #tpu.memory_space<vmem>>, vector<1x32xf32>
    %127 = vector.broadcast %126 : vector<1x32xf32> to vector<16x32xf32>
    %128 = arith.addf %125, %127 : vector<16x32xf32>
    %129 = arith.addf %128, %83 : vector<16x32xf32>
    %c0_47 = arith.constant 0 : index
    %c0_48 = arith.constant 0 : index
    %130 = vector.load %arg14[%c0_47, %c0_48] : memref<16x32xf32, #tpu.memory_space<vmem>>, vector<16x32xf32>
    tpu.vector_store %arg14[%c0_47, %c0_48], %129 {strides = array<i32>} : memref<16x32xf32, #tpu.memory_space<vmem>>, vector<16x32xf32>,
    return
  }
  func.func @transform_0(%arg0: i32) -> (i32, i32) {
    %c0_i32 = arith.constant 0 : i32
    %c0_i32_0 = arith.constant 0 : i32
    %c0_i32_1 = arith.constant 0 : i32
    return %c0_i32, %c0_i32_0 : i32, i32
  }
  func.func @transform_1(%arg0: i32) -> (i32, i32) {
    %c0_i32 = arith.constant 0 : i32
    %c0_i32_0 = arith.constant 0 : i32
    %c0_i32_1 = arith.constant 0 : i32
    return %c0_i32, %c0_i32_0 : i32, i32
  }
  func.func @transform_2(%arg0: i32) -> (i32, i32) {
    %c0_i32 = arith.constant 0 : i32
    %c0_i32_0 = arith.constant 0 : i32
    %c0_i32_1 = arith.constant 0 : i32
    return %c0_i32, %c0_i32_0 : i32, i32
  }
  func.func @transform_3(%arg0: i32) -> (i32, i32) {
    %c0_i32 = arith.constant 0 : i32
    %c0_i32_0 = arith.constant 0 : i32
    %c0_i32_1 = arith.constant 0 : i32
    return %c0_i32, %c0_i32_0 : i32, i32
  }
  func.func @transform_4(%arg0: i32) -> (i32, i32) {
    %c0_i32 = arith.constant 0 : i32
    %c0_i32_0 = arith.constant 0 : i32
    %c0_i32_1 = arith.constant 0 : i32
    return %c0_i32, %c0_i32_0 : i32, i32
  }
  func.func @transform_5(%arg0: i32) -> (i32, i32) {
    %c0_i32 = arith.constant 0 : i32
    %c0_i32_0 = arith.constant 0 : i32
    %c0_i32_1 = arith.constant 0 : i32
    return %c0_i32, %c0_i32_0 : i32, i32
  }
  func.func @transform_6(%arg0: i32) -> (i32, i32) {
    %c0_i32 = arith.constant 0 : i32
    %c0_i32_0 = arith.constant 0 : i32
    %c0_i32_1 = arith.constant 0 : i32
    return %c0_i32, %c0_i32_0 : i32, i32
  }
  func.func @transform_7(%arg0: i32) -> (i32, i32) {
    %c0_i32 = arith.constant 0 : i32
    %c0_i32_0 = arith.constant 0 : i32
    %c0_i32_1 = arith.constant 0 : i32
    return %c0_i32, %c0_i32_0 : i32, i32
  }
  func.func @transform_8(%arg0: i32) -> (i32, i32) {
    %c0_i32 = arith.constant 0 : i32
    %c0_i32_0 = arith.constant 0 : i32
    %c0_i32_1 = arith.constant 0 : i32
    return %c0_i32, %c0_i32_0 : i32, i32
  }
  func.func @transform_9(%arg0: i32) -> (i32, i32) {
    %c0_i32 = arith.constant 0 : i32
    %c0_i32_0 = arith.constant 0 : i32
    %c0_i32_1 = arith.constant 0 : i32
    return %c0_i32, %c0_i32_0 : i32, i32
  }
  func.func @transform_10(%arg0: i32) -> (i32, i32) {
    %c0_i32 = arith.constant 0 : i32
    %c0_i32_0 = arith.constant 0 : i32
    %c0_i32_1 = arith.constant 0 : i32
    return %c0_i32, %c0_i32_0 : i32, i32
  }
  func.func @transform_11(%arg0: i32) -> (i32, i32) {
    %c0_i32 = arith.constant 0 : i32
    %c0_i32_0 = arith.constant 0 : i32
    %c0_i32_1 = arith.constant 0 : i32
    return %c0_i32, %c0_i32_0 : i32, i32
  }
  func.func @transform_12(%arg0: i32) -> (i32, i32) {
    %c0_i32 = arith.constant 0 : i32
    %c0_i32_0 = arith.constant 0 : i32
    %c0_i32_1 = arith.constant 0 : i32
    return %c0_i32, %c0_i32_0 : i32, i32
  }
  func.func @transform_13(%arg0: i32) -> (i32, i32) {
    %c0_i32 = arith.constant 0 : i32
    %c0_i32_0 = arith.constant 0 : i32
    %c0_i32_1 = arith.constant 0 : i32
    return %c0_i32, %c0_i32_0 : i32, i32
  }
}

</mosaic_0001>

<bundles_post_ra>
// kernel: transformer_layer.1
= control target key start
LH: loop header
LB: loop body
LE: loop exit
PB: predicated region body
PF: predicated region fallthrough
CT: control target
= control target key end

     0   :  { %18 = vsyncpa [#allocation3], 0  ;;  %s2696_s0 = inlined_call_operand.hbm [shape: f32[16,32], index: 0, kind: input, shape index: {}]   ;;  %s2697_s1 = inlined_call_operand.vmem [shape: f32[32,96], index: 1, kind: input, shape index: {}]   ;;  %s2698_s2 = inlined_call_operand.vmem [shape: f32[1,96], index: 2, kind: input, shape index: {}]   ;;  %s2699_s3 = inlined_call_operand.vmem [shape: f32[32,32], index: 3, kind: input, shape index: {}]   ;;  %s2700_s4 = inlined_call_operand.vmem [shape: f32[1,32], index: 4, kind: input, shape index: {}]   ;;  %s2701_s5 = inlined_call_operand.vmem [shape: f32[32,64], index: 5, kind: input, shape index: {}]   ;;  %s2702_s6 = inlined_call_operand.vmem [shape: f32[1,64], index: 6, kind: input, shape index: {}]   ;;  %s2703_s7 = inlined_call_operand.vmem [shape: f32[64,32], index: 7, kind: input, shape index: {}]   ;;  %s2704_s8 = inlined_call_operand.vmem [shape: f32[1,32], index: 8, kind: input, shape index: {}]   ;;  %s2705_s9 = inlined_call_operand.vmem [shape: f32[1,32], index: 9, kind: input, shape index: {}]   ;;  %s2706_s10 = inlined_call_operand.vmem [shape: f32[1,32], index: 10, kind: input, shape index: {}]   ;;  %s2707_s11 = inlined_call_operand.vmem [shape: f32[1,32], index: 11, kind: input, shape index: {}]   ;;  %s2708_s12 = inlined_call_operand.vmem [shape: f32[1,32], index: 12, kind: input, shape index: {}]   ;;  %s2709_s13 = inlined_call_operand.hbm [shape: f32[16,32], index: 13, kind: output, shape index: {}]  }
   0x1   :  { %19 = vsyncpa [#allocation4], 0  ;;  %s2301_s25 = smov [#allocation2]   ;;  %s2253_s29 = scalar_lea.hbm %s2696_s0, 256 }
   0x2   :  { %s25_s26 = sshll.u32 %s2301_s25, 4  ;;  %p2254_p0 = scmp.ne.s32.totalorder %s2696_s0, %s2253_s29  ;;  %s26_s26 = int_to_ptr.vmem [resolvable:$true] %s25_s26 }
   0x3   :  { %p2257_p1 = scmp.lt.u32.totalorder %s2253_s29, %s2696_s0 }
   0x5   :  { %p2259_p2 = pnand %p2257_p1, %p2254_p0 }
   0x7   :  { %2262 = shalt.err (!%p2259_p2)
}
   0x8   :  { %s2263_s17 = scalar_lea.vmem %s26_s26, 256  ;;  %p2268_p4 = scmp.lt.s32.totalorder %s26_s26, %s26_s26 }
   0x9   :  { %p2264_p3 = scmp.ne.s32.totalorder %s26_s26, %s2263_s17  ;;  %p2269_p5 = scmp.lt.s32.totalorder %s2263_s17, %s2263_s17 }
   0xb   :  { %p2270_p6 = por %p2269_p5, %p2268_p4 }
   0xd   :  { %p2271_p7 = pnand %p2270_p6, %p2264_p3 }
   0xf   :  { %2274 = shalt.err (!%p2271_p7)
}
  0x10   :  { %s2302_s18 = smov 128   ;;  %s2303_s19 = smov 8  }
  0x11   :  { %31 = dma.hbm_to_vmem [thread:$0]  %s2696_s0, 256, %s26_s26, [#allocation3], %s2302_s18, %s2302_s18, %s2303_s19  }
  0x12   :  { %2297 = dma.done.wait [#allocation3], 256  }
  0x13   :  { %2298 = vsyncadd [#allocation3], 4294967040  ;;  %vm67_vm0 = vcmask 261120   ;;  %v2399_v0 = vld [vmem:[#allocation2] sm:$0xff]  ;;  %v2401_v1 = vld [vmem:[#allocation2 + $0x8] sm:$0xff]  ;;  %v2304_v37 = vmov 0.0  }
  0x14   :  { %v68_v2 = vsel %vm67_vm0, %v2399_v0, 0.0  ;;  %v71_v3 = vsel %vm67_vm0, %v2401_v1, 0.0  ;;  %v61_v14 = vld [vmem:[%s2697_s1] sm:$0xff]  ;;  %v62_v15 = vld [vmem:[%s2697_s1 + $0x8] sm:$0xff]  ;;  %v63_v16 = vld [vmem:[%s2697_s1 + $0x10] sm:$0xff]  ;;  %2045 = vmatprep.subr.mxu0 %v2304_v37  ;;  %vm2305_vm1 = vmmov 0  }
  0x15   :  { %69 = vadd.xlane.f32.xlu0 %v68_v2  ;;  %v2156_v17 = vpack.c.bf16 %v62_v15, %v61_v14  ;;  %v64_v18 = vld [vmem:[%s2697_s1 + $0x18] sm:$0xff]  ;;  %v1924_v27 = vld [vmem:[%s2705_s9] ss:$0 sm:$0xff]  ;;  %2047 = vmatprep.mubr.msk.f32.mxu0 %vm2305_vm1, %v2304_v37  ;;  %s2306_s9 = smov 120   ;;  %s2309_s17 = smov 96   ;;  %vm215_vm2 = vcmask 64512  }
  0x16   :  { %v2160_v19 = vpack.c.bf16 %v64_v18, %v63_v16  ;;  %v1925_v29 = vld [vmem:[%s2706_s10] ss:$0 sm:$0xff]  ;;  %s2308_s10 = smov 104   ;;  %s2310_s20 = smov 64   ;;  %vm1552_vm3 = vcmask 130048   ;;  %vm1555_vm4 = vcmask 195584  }
  0x17   :  { %2157 = vmatprep.subr.bf16.mxu1 %v2156_v17  ;;  %v1926_v36 = vld [vmem:[%s2698_s2] ss:$0 sm:$0xff]  ;;  %s2307_s2 = smov 112   ;;  %s2311_s28 = smov 16   ;;  %vm1821_vm5 = vcmask 523264  }
  0x18   :  { %2159 = vmatpush3.bf16.msra.mxu1 %v2156_v17 }
  0x19   :  { %72 = vadd.xlane.f32.xlu0 %v71_v3  ;;  %2161 = vmatprep.subr.bf16.mxu1 %v2160_v19 }
  0x1c   :  { %2163 = vmatpush3.bf16.msra.mxu1 %v2160_v19 }
  0x1d   :  { %2035 = vmatprep.subr.mxu1 %v2304_v37 }
  0xa2   :  { %v70_v4 = vpop.xlane.xlu0 %69 }
  0xa3   :  { %v75_v5 = vmul.f32 0.03125, %v70_v4 }
  0xa5   :  { %v77_v6 = vsub.f32 %v2399_v0, %v75_v5 }
  0xa6   :  { %v73_v7 = vpop.xlane.xlu0 %72 }
  0xa7   :  { %v76_v8 = vmul.f32 0.03125, %v73_v7  ;;  %v79_v9 = vmul.f32 %v77_v6, %v77_v6 }
  0xa9   :  { %v78_v10 = vsub.f32 %v2401_v1, %v76_v8  ;;  %v81_v11 = vsel %vm67_vm0, %v79_v9, 0.0 }
  0xaa   :  { %82 = vadd.xlane.f32.xlu1 %v81_v11 }
  0xab   :  { %v80_v12 = vmul.f32 %v78_v10, %v78_v10 }
  0xad   :  { %v84_v13 = vsel %vm67_vm0, %v80_v12, 0.0 }
  0xae   :  { %85 = vadd.xlane.f32.xlu1 %v84_v13 }
 0x137   :  { %v83_v20 = vpop.xlane.xlu1 %82 }
 0x138   :  { %v87_v21 = vmul.f32 0.03125, %v83_v20 }
 0x13a   :  { %v89_v22 = vadd.f32 1e-05, %v87_v21 }
 0x13b   :  { %v86_v23 = vpop.xlane.xlu1 %85 }
 0x13c   :  { %2209 = vrsqrt.f32 %v89_v22  ;;  %v88_v24 = vmul.f32 0.03125, %v86_v23 }
 0x13e   :  { %v90_v25 = vadd.f32 1e-05, %v88_v24 }
 0x140   :  { %2211 = vrsqrt.f32 %v90_v25 }
 0x146   :  { %v2210_v26 = vpop.eup %2209 }
 0x147   :  { %v93_v28 = vmul.f32 %v2210_v26, %v77_v6 }
 0x149   :  { %v101_v30 = vmul.f32 %v1924_v27, %v93_v28 }
 0x14a   :  { %v2212_v31 = vpop.eup %2211 }
 0x14b   :  { %v94_v32 = vmul.f32 %v2212_v31, %v78_v10  ;;  %v109_v33 = vadd.f32 %v1925_v29, %v101_v30 }
 0x14d   :  { %v102_v34 = vmul.f32 %v1924_v27, %v94_v32  ;;  %2032 = vmatprep.mubr.msk.f32.mxu1 %vm67_vm0, %v109_v33 }
 0x14f   :  { %v110_v35 = vadd.f32 %v1925_v29, %v102_v34 }
 0x151   :  { %2033 = vmatmul.mubr.msk.f32.vlgmr.msra.gmra.mrb[0].mxu1 %vm67_vm0, %v110_v35 }
 0x152   :  { %2037 = vmatprep.mubr.msk.f32.mxu1 %vm2305_vm1, %v2304_v37 }
 0x224   :  { %v2034_v38 = vpop.f32.mrb[0].mxu1 }
 0x225   :  { %v2440_v39 = vadd.f32 %v2034_v38, %v1926_v36  ;;  %v190_v40 = vpop.f32.mrb[1].mxu1 }
 0x226   :  { %v2442_v41 = vadd.f32 %v1926_v36, %v190_v40 }
 0x227   :  { %203 = vrot.lane.b32.xlu1 %v2440_v39, %s2306_s9 }
 0x228   :  { %201 = vrot.lane.b32.xlu0 %v2442_v41, %s2306_s9  ;;  %s2313_s9 = smov [#allocation5]  }
 0x22b   :  { %205 = vrot.lane.b32.xlu1 %v2442_v41, %s2307_s2 }
 0x22c   :  { %209 = vrot.lane.b32.xlu0 %v2442_v41, %s2308_s10 }
 0x22f   :  { %207 = vrot.lane.b32.xlu1 %v2440_v39, %s2307_s2  ;;  %s1912_s2 = sshll.u32 %s2313_s9, 4  ;;  %s1913_s2 = int_to_ptr.vmem [resolvable:$true] %s1912_s2 }
 0x230   :  { %213 = vrot.lane.b32.xlu0 %v2442_v41, %s2309_s17  ;;  %p2280_p9 = scmp.lt.s32.totalorder %s1913_s2, %s1913_s2 }
 0x233   :  { %211 = vrot.lane.b32.xlu1 %v2440_v39, %s2308_s10  ;;  %s2275_s10 = scalar_lea.vmem %s1913_s2, 256 }
 0x234   :  { %p2276_p8 = scmp.ne.s32.totalorder %s1913_s2, %s2275_s10  ;;  %p2281_p10 = scmp.lt.s32.totalorder %s2275_s10, %s2275_s10 }
 0x236   :  { %p2282_p11 = por %p2281_p10, %p2280_p9 }
 0x237   :  { %290 = vrot.lane.b32.xlu1 %v2440_v39, %s2309_s17 }
 0x238   :  { %p2283_p12 = pnand %p2282_p11, %p2276_p8 }
 0x299   :  { %v2452_v42 = vpop.permute.xlu1 %203 }
 0x29a   :  { %442 = vrot.lane.b32.xlu1 %v2452_v42, %s2309_s17  ;;  %v2455_v43 = vpop.permute.xlu0 %201 }
 0x29b   :  { %366 = vrot.lane.b32.xlu0 %v2455_v43, %s2309_s17 }
 0x29d   :  { %v2458_v44 = vpop.permute.xlu1 %205 }
 0x29e   :  { %v2460_v45 = vpop.permute.xlu0 %209 }
 0x29f   :  { %518 = vrot.lane.b32.xlu0 %v2458_v44, %s2309_s17 }
 0x2a1   :  { %v2463_v46 = vpop.permute.xlu1 %207 }
 0x2a2   :  { %594 = vrot.lane.b32.xlu1 %v2463_v46, %s2309_s17  ;;  %v214_v47 = vpop.permute.xlu0 %213 }
 0x2a3   :  { %670 = vrot.lane.b32.xlu0 %v2460_v45, %s2309_s17  ;;  %2036 = vmatpush3.xpose.msk.msra.mxu1 %vm215_vm2, %v214_v47 }
 0x2a4   :  { %2040 = vmatprep.subr.mxu1 %v2304_v37 }
 0x2a5   :  { %v2469_v48 = vpop.permute.xlu1 %211 }
 0x2a6   :  { %746 = vrot.lane.b32.xlu1 %v2469_v48, %s2309_s17  ;;  %2038 = vmatmul.mubr.msk.f32.vlgmr.msra.gmra.mrb[2].mxu1 %vm215_vm2, %v2442_v41 }
 0x2a7   :  { %2042 = vmatprep.mubr.msk.f32.mxu1 %vm2305_vm1, %v2304_v37 }
 0x2a9   :  { %v291_v49 = vpop.permute.xlu1 %290 }
 0x2aa   :  { %2041 = vmatpush3.xpose.msk.msra.mxu1 %vm215_vm2, %v291_v49 }
 0x2ab   :  { %2050 = vmatprep.subr.mxu1 %v2304_v37 }
 0x2ad   :  { %2043 = vmatmul.mubr.msk.f32.vlgmr.msra.gmra.mrb[4].mxu1 %vm215_vm2, %v2440_v39 }
 0x2ae   :  { %2052 = vmatprep.mubr.msk.f32.mxu1 %vm2305_vm1, %v2304_v37 }
 0x30c   :  { %v443_v50 = vpop.permute.xlu1 %442 }
 0x30d   :  { %2051 = vmatpush3.xpose.msk.msra.mxu1 %vm215_vm2, %v443_v50  ;;  %v367_v51 = vpop.permute.xlu0 %366 }
 0x30e   :  { %2046 = vmatpush3.xpose.msk.msra.mxu0 %vm215_vm2, %v367_v51  ;;  %2060 = vmatprep.subr.mxu1 %v2304_v37 }
 0x30f   :  { %2055 = vmatprep.subr.mxu0 %v2304_v37 }
 0x310   :  { %2053 = vmatmul.mubr.msk.f32.vlgmr.msra.gmra.mrb[6].mxu1 %vm215_vm2, %v2452_v42 }
 0x311   :  { %2048 = vmatmul.mubr.msk.f32.vlgmr.msra.gmra.mrb[0].mxu0 %vm215_vm2, %v2455_v43  ;;  %v519_v52 = vpop.permute.xlu0 %518  ;;  %2062 = vmatprep.mubr.msk.f32.mxu1 %vm2305_vm1, %v2304_v37 }
 0x312   :  { %2056 = vmatpush3.xpose.msk.msra.mxu0 %vm215_vm2, %v519_v52  ;;  %2057 = vmatprep.mubr.msk.f32.mxu0 %vm2305_vm1, %v2304_v37 }
 0x313   :  { %2065 = vmatprep.subr.mxu0 %v2304_v37 }
 0x314   :  { %v595_v53 = vpop.permute.xlu1 %594 }
 0x315   :  { %2058 = vmatmul.mubr.msk.f32.vlgmr.msra.gmra.mrb[2].mxu0 %vm215_vm2, %v2458_v44  ;;  %2061 = vmatpush3.xpose.msk.msra.mxu1 %vm215_vm2, %v595_v53  ;;  %v671_v54 = vpop.permute.xlu0 %670 }
 0x316   :  { %2066 = vmatpush3.xpose.msk.msra.mxu0 %vm215_vm2, %v671_v54  ;;  %2067 = vmatprep.mubr.msk.f32.mxu0 %vm2305_vm1, %v2304_v37 }
 0x317   :  { %2070 = vmatprep.subr.mxu1 %v2304_v37  ;;  %2075 = vmatprep.subr.mxu0 %v2304_v37 }
 0x318   :  { %v747_v55 = vpop.permute.xlu1 %746  ;;  %2063 = vmatmul.mubr.msk.f32.vlgmr.msra.gmra.mrb[8].mxu1 %vm215_vm2, %v2463_v46 }
 0x319   :  { %2068 = vmatmul.mubr.msk.f32.vlgmr.msra.gmra.mrb[4].mxu0 %vm215_vm2, %v2460_v45  ;;  %2071 = vmatpush3.xpose.msk.msra.mxu1 %vm215_vm2, %v747_v55 }
 0x31a   :  { %2072 = vmatprep.mubr.msk.f32.mxu1 %vm2305_vm1, %v2304_v37  ;;  %2080 = vmatprep.subr.mxu1 %v2304_v37 }
 0x31b   :  { %2077 = vmatprep.mubr.msk.f32.mxu0 %vm2305_vm1, %v2304_v37 }
 0x31c   :  { %2073 = vmatmul.mubr.msk.f32.vlgmr.msra.gmra.mrb[10].mxu1 %vm215_vm2, %v2469_v48 }
 0x31d   :  { %2082 = vmatprep.mubr.msk.f32.mxu1 %vm2305_vm1, %v2304_v37 }
 0x379   :  { %v286_v56 = vpop.f32.mrb[2].mxu1 }
 0x37a   :  { %v822_v57 = vmul.f32 0.35355338, %v286_v56  ;;  %v2039_v58 = vpop.f32.mrb[3].mxu1 }
 0x37c   :  { %v830_v59 = vsel %vm215_vm2, %v822_v57, -inf }
 0x37d   :  { %831 = vmax.xlane.f32.xlu0 %v830_v59 }
 0x380   :  { %v362_v60 = vpop.f32.mrb[4].mxu1 }
 0x381   :  { %v823_v61 = vmul.f32 0.35355338, %v362_v60  ;;  %v2044_v62 = vpop.f32.mrb[5].mxu1 }
 0x383   :  { %v833_v63 = vsel %vm215_vm2, %v823_v61, -inf }
 0x384   :  { %834 = vmax.xlane.f32.xlu1 %v833_v63 }
 0x3e3   :  { %v514_v2 = vpop.f32.mrb[6].mxu1 }
 0x3e4   :  { %v825_v3 = vmul.f32 0.35355338, %v514_v2  ;;  %v438_v4 = vpop.f32.mrb[0].mxu0  ;;  %v2054_v5 = vpop.f32.mrb[7].mxu1 }
 0x3e5   :  { %v2049_v6 = vpop.f32.mrb[1].mxu0  ;;  %v824_v7 = vmul.f32 0.35355338, %v438_v4 }
 0x3e6   :  { %v839_v8 = vsel %vm215_vm2, %v825_v3, -inf }
 0x3e7   :  { %840 = vmax.xlane.f32.xlu0 %v839_v8  ;;  %v836_v12 = vsel %vm215_vm2, %v824_v7, -inf }
 0x3e8   :  { %v590_v9 = vpop.f32.mrb[2].mxu0 }
 0x3e9   :  { %v2059_v10 = vpop.f32.mrb[3].mxu0  ;;  %v826_v11 = vmul.f32 0.35355338, %v590_v9 }
 0x3eb   :  { %v666_v13 = vpop.f32.mrb[8].mxu1  ;;  %837 = vmax.xlane.f32.xlu0 %v836_v12  ;;  %v842_v20 = vsel %vm215_vm2, %v826_v11, -inf }
 0x3ec   :  { %v827_v14 = vmul.f32 0.35355338, %v666_v13  ;;  %v2064_v15 = vpop.f32.mrb[9].mxu1  ;;  %v742_v16 = vpop.f32.mrb[4].mxu0 }
 0x3ed   :  { %v2069_v17 = vpop.f32.mrb[5].mxu0  ;;  %v828_v18 = vmul.f32 0.35355338, %v742_v16 }
 0x3ee   :  { %v845_v19 = vsel %vm215_vm2, %v827_v14, -inf }
 0x3ef   :  { %846 = vmax.xlane.f32.xlu1 %v845_v19  ;;  %v818_v21 = vpop.f32.mrb[10].mxu1  ;;  %843 = vmax.xlane.f32.xlu0 %v842_v20  ;;  %v848_v25 = vsel %vm215_vm2, %v828_v18, -inf }
 0x3f0   :  { %v829_v22 = vmul.f32 0.35355338, %v818_v21  ;;  %v2074_v23 = vpop.f32.mrb[11].mxu1 }
 0x3f2   :  { %v851_v24 = vsel %vm215_vm2, %v829_v22, -inf }
 0x3f3   :  { %852 = vmax.xlane.f32.xlu1 %v851_v24  ;;  %849 = vmax.xlane.f32.xlu0 %v848_v25 }
 0x404   :  { %994 = vrot.lane.b32.xlu1 %v2440_v39, %s2310_s20 }
 0x408   :  { %1070 = vrot.lane.b32.xlu1 %v2455_v43, %s2310_s20 }
 0x409   :  { %918 = vrot.lane.b32.xlu0 %v2442_v41, %s2310_s20 }
 0x40a   :  { %v832_v26 = vpop.xlane.xlu0 %831 }
 0x40b   :  { %v854_v27 = vsub.f32 %v822_v57, %v832_v26 }
 0x40c   :  { %1146 = vrot.lane.b32.xlu1 %v2452_v42, %s2310_s20 }
 0x40d   :  { %1222 = vrot.lane.b32.xlu0 %v2458_v44, %s2310_s20  ;;  %v862_v28 = vmul.f32 1.442695, %v854_v27 }
 0x40f   :  { %2213 = vpow2.f32 %v862_v28 }
 0x410   :  { %1298 = vrot.lane.b32.xlu1 %v2463_v46, %s2310_s20 }
 0x411   :  { %v835_v29 = vpop.xlane.xlu1 %834 }
 0x412   :  { %v855_v30 = vsub.f32 %v823_v61, %v835_v29 }
 0x414   :  { %v864_v31 = vmul.f32 1.442695, %v855_v30 }
 0x416   :  { %2215 = vpow2.f32 %v864_v31 }
 0x419   :  { %v2538_v32 = vpop.eup %2213 }
 0x41a   :  { %v878_v33 = vsel %vm215_vm2, %v2538_v32, 0.0 }
 0x420   :  { %v2542_v34 = vpop.eup %2215 }
 0x421   :  { %v881_v35 = vsel %vm215_vm2, %v2542_v34, 0.0 }
 0x42c   :  { %879 = vadd.xlane.f32.xlu0 %v878_v33 }
 0x434   :  { %882 = vadd.xlane.f32.xlu1 %v881_v35 }
 0x474   :  { %v841_v36 = vpop.xlane.xlu0 %840 }
 0x475   :  { %v857_v38 = vsub.f32 %v825_v3, %v841_v36 }
 0x477   :  { %v868_v39 = vmul.f32 1.442695, %v857_v38 }
 0x478   :  { %v838_v40 = vpop.xlane.xlu0 %837 }
 0x479   :  { %2217 = vpow2.f32 %v868_v39  ;;  %v856_v41 = vsub.f32 %v824_v7, %v838_v40 }
 0x47b   :  { %v866_v42 = vmul.f32 1.442695, %v856_v41 }
 0x47c   :  { %v847_v43 = vpop.xlane.xlu1 %846  ;;  %v844_v44 = vpop.xlane.xlu0 %843 }
 0x47d   :  { %2219 = vpow2.f32 %v866_v42  ;;  %v859_v46 = vsub.f32 %v827_v14, %v847_v43  ;;  %v858_v47 = vsub.f32 %v826_v11, %v844_v44  ;;  %v1558_v42 = vld [vmem:[%s2699_s3] sm:$0xff]  ;;  %v1559_v43 = vld [vmem:[%s2699_s3 + $0x8] sm:$0xff] }
 0x47e   :  { %v2164_v44 = vpack.c.bf16 %v1559_v43, %v1558_v42  ;;  %v1957_v42 = vld [vmem:[%s2708_s12] ss:$0 sm:$0xff] }
 0x47f   :  { %v872_v49 = vmul.f32 1.442695, %v859_v46  ;;  %v870_v50 = vmul.f32 1.442695, %v858_v47  ;;  %v1561_v46 = vld [vmem:[%s2699_s3 + $0x18] sm:$0xff] }
 0x480   :  { %v853_v51 = vpop.xlane.xlu1 %852  ;;  %v850_v52 = vpop.xlane.xlu0 %849 }
 0x481   :  { %2221 = vpow2.f32 %v872_v49  ;;  %v861_v53 = vsub.f32 %v829_v22, %v853_v51  ;;  %v860_v54 = vsub.f32 %v828_v18, %v850_v52 }
 0x482   :  { %2223 = vpow2.f32 %v870_v50 }
 0x483   :  { %v2218_v55 = vpop.eup %2217  ;;  %v876_v56 = vmul.f32 1.442695, %v861_v53  ;;  %v874_v57 = vmul.f32 1.442695, %v860_v54 }
 0x484   :  { %v995_v58 = vpop.permute.xlu1 %994  ;;  %v919_v59 = vpop.permute.xlu0 %918  ;;  %v887_v60 = vsel %vm215_vm2, %v2218_v55, 0.0 }
 0x485   :  { %2225 = vpow2.f32 %v876_v56  ;;  %2081 = vmatpush3.msra.mxu1 %v995_v58  ;;  %888 = vadd.xlane.f32.xlu1 %v887_v60 }
 0x486   :  { %2227 = vpow2.f32 %v874_v57  ;;  %2076 = vmatpush3.msra.mxu0 %v919_v59  ;;  %2090 = vmatprep.subr.mxu1 %v2304_v37 }
 0x487   :  { %v2220_v61 = vpop.eup %2219  ;;  %2085 = vmatprep.subr.mxu0 %v2304_v37 }
 0x488   :  { %v884_v62 = vsel %vm215_vm2, %v2220_v61, 0.0  ;;  %v1071_v9 = vpop.permute.xlu1 %1070  ;;  %v1223_v10 = vpop.permute.xlu0 %1222 }
 0x489   :  { %885 = vadd.xlane.f32.xlu0 %v884_v62 }
 0x48b   :  { %v2222_v63 = vpop.eup %2221 }
 0x48c   :  { %v2224_v2 = vpop.eup %2223  ;;  %v893_v3 = vsel %vm215_vm2, %v2222_v63, 0.0  ;;  %v1147_v11 = vpop.permute.xlu1 %1146 }
 0x48d   :  { %894 = vadd.xlane.f32.xlu1 %v893_v3  ;;  %v890_v4 = vsel %vm215_vm2, %v2224_v2, 0.0 }
 0x48e   :  { %891 = vadd.xlane.f32.xlu0 %v890_v4 }
 0x48f   :  { %v2552_v5 = vpop.eup %2225 }
 0x490   :  { %v2554_v6 = vpop.eup %2227  ;;  %v899_v7 = vsel %vm215_vm2, %v2552_v5, 0.0  ;;  %v1299_v13 = vpop.permute.xlu1 %1298 }
 0x491   :  { %900 = vadd.xlane.f32.xlu1 %v899_v7  ;;  %v896_v8 = vsel %vm215_vm2, %v2554_v6, 0.0 }
 0x492   :  { %897 = vadd.xlane.f32.xlu0 %v896_v8 }
 0x4a2   :  { %1450 = vrot.lane.b32.xlu1 %v2469_v48, %s2310_s20 }
 0x4a8   :  { %1374 = vrot.lane.b32.xlu0 %v2460_v45, %s2310_s20 }
 0x4b9   :  { %v880_v12 = vpop.xlane.xlu0 %879 }
 0x4ba   :  { %2229 = vrcp.f32 %v880_v12 }
 0x4c1   :  { %v883_v14 = vpop.xlane.xlu1 %882 }
 0x4c2   :  { %2231 = vrcp.f32 %v883_v14 }
 0x4c4   :  { %v2230_v15 = vpop.eup %2229 }
 0x4c5   :  { %v910_v16 = vmul.f32 %v2230_v15, %v2538_v32 }
 0x4c7   :  { %2078 = vmatmul.mubr.msk.f32.vlgmr.msra.gmra.mrb[6].mxu0 %vm215_vm2, %v910_v16 }
 0x4c8   :  { %2086 = vmatpush3.msra.mxu0 %v1071_v9  ;;  %2087 = vmatprep.mubr.msk.f32.mxu0 %vm2305_vm1, %v2304_v37 }
 0x4c9   :  { %2095 = vmatprep.subr.mxu0 %v2304_v37 }
 0x4cc   :  { %v2232_v45 = vpop.eup %2231 }
 0x4cd   :  { %v911_v48 = vmul.f32 %v2232_v45, %v2542_v34 }
 0x4cf   :  { %2083 = vmatmul.mubr.msk.f32.vlgmr.msra.gmra.mrb[12].mxu1 %vm215_vm2, %v911_v48 }
 0x4d0   :  { %2091 = vmatpush3.msra.mxu1 %v1147_v11  ;;  %2092 = vmatprep.mubr.msk.f32.mxu1 %vm2305_vm1, %v2304_v37  ;;  %v1953_v11 = vld [vmem:[%s2700_s4] ss:$0 sm:$0xff] }
 0x4d1   :  { %2100 = vmatprep.subr.mxu1 %v2304_v37 }
 0x512   :  { %v889_v17 = vpop.xlane.xlu1 %888 }
 0x513   :  { %2233 = vrcp.f32 %v889_v17 }
 0x516   :  { %v886_v18 = vpop.xlane.xlu0 %885 }
 0x517   :  { %2235 = vrcp.f32 %v886_v18 }
 0x51a   :  { %v895_v19 = vpop.xlane.xlu1 %894 }
 0x51b   :  { %2237 = vrcp.f32 %v895_v19  ;;  %v892_v20 = vpop.xlane.xlu0 %891 }
 0x51c   :  { %2239 = vrcp.f32 %v892_v20 }
 0x51d   :  { %v2234_v21 = vpop.eup %2233 }
 0x51e   :  { %v913_v22 = vmul.f32 %v2234_v21, %v2218_v55  ;;  %v901_v23 = vpop.xlane.xlu1 %900 }
 0x51f   :  { %2241 = vrcp.f32 %v901_v23  ;;  %v898_v24 = vpop.xlane.xlu0 %897 }
 0x520   :  { %2243 = vrcp.f32 %v898_v24  ;;  %2093 = vmatmul.mubr.msk.f32.vlgmr.msra.gmra.mrb[14].mxu1 %vm215_vm2, %v913_v22 }
 0x521   :  { %v2236_v25 = vpop.eup %2235  ;;  %2101 = vmatpush3.msra.mxu1 %v1299_v13  ;;  %2102 = vmatprep.mubr.msk.f32.mxu1 %vm2305_vm1, %v2304_v37 }
 0x522   :  { %v912_v26 = vmul.f32 %v2236_v25, %v2220_v61  ;;  %2110 = vmatprep.subr.mxu1 %v2304_v37  ;;  %v1451_v31 = vpop.permute.xlu1 %1450 }
 0x523   :  { %v1375_v33 = vpop.permute.xlu0 %1374 }
 0x524   :  { %2088 = vmatmul.mubr.msk.f32.vlgmr.msra.gmra.mrb[8].mxu0 %vm215_vm2, %v912_v26  ;;  %v1696_v26 = vld [vmem:[%s2701_s5] sm:$0xff] }
 0x525   :  { %v2238_v27 = vpop.eup %2237  ;;  %2096 = vmatpush3.msra.mxu0 %v1223_v10  ;;  %2097 = vmatprep.mubr.msk.f32.mxu0 %vm2305_vm1, %v2304_v37 }
 0x526   :  { %v2240_v28 = vpop.eup %2239  ;;  %v915_v29 = vmul.f32 %v2238_v27, %v2222_v63  ;;  %2105 = vmatprep.subr.mxu0 %v2304_v37  ;;  %v1697_v27 = vld [vmem:[%s2701_s5 + $0x8] sm:$0xff] }
 0x527   :  { %v914_v30 = vmul.f32 %v2240_v28, %v2224_v2  ;;  %v2172_v28 = vpack.c.bf16 %v1697_v27, %v1696_v26 }
 0x528   :  { %2103 = vmatmul.mubr.msk.f32.vlgmr.msra.gmra.mrb[16].mxu1 %vm215_vm2, %v915_v29  ;;  %v1698_v29 = vld [vmem:[%s2701_s5 + $0x10] sm:$0xff] }
 0x529   :  { %v2242_v32 = vpop.eup %2241  ;;  %2098 = vmatmul.mubr.msk.f32.vlgmr.msra.gmra.mrb[10].mxu0 %vm215_vm2, %v914_v30  ;;  %2111 = vmatpush3.msra.mxu1 %v1451_v31  ;;  %v1699_v30 = vld [vmem:[%s2701_s5 + $0x18] sm:$0xff] }
 0x52a   :  { %v2244_v34 = vpop.eup %2243  ;;  %v917_v35 = vmul.f32 %v2242_v32, %v2552_v5  ;;  %2106 = vmatpush3.msra.mxu0 %v1375_v33  ;;  %2107 = vmatprep.mubr.msk.f32.mxu0 %vm2305_vm1, %v2304_v37  ;;  %v2176_v31 = vpack.c.bf16 %v1699_v30, %v1698_v29 }
 0x52b   :  { %v916_v36 = vmul.f32 %v2244_v34, %v2554_v6  ;;  %2112 = vmatprep.mubr.msk.f32.mxu1 %vm2305_vm1, %v2304_v37  ;;  %2165 = vmatprep.subr.bf16.mxu0 %v2164_v44  ;;  %v1560_v37 = vld [vmem:[%s2699_s3 + $0x10] sm:$0xff]  ;;  %s2312_s3 = smov 24  }
 0x52c   :  { %2113 = vmatmul.mubr.msk.f32.vlgmr.msra.gmra.mrb[18].mxu1 %vm215_vm2, %v917_v35  ;;  %v2168_v47 = vpack.c.bf16 %v1561_v46, %v1560_v37  ;;  %2173 = vmatprep.subr.bf16.mxu1 %v2172_v28 }
 0x52d   :  { %2108 = vmatmul.mubr.msk.f32.vlgmr.msra.gmra.mrb[12].mxu0 %vm215_vm2, %v916_v36  ;;  %2175 = vmatpush3.bf16.msra.mxu1 %v2172_v28 }
 0x52e   :  { %2167 = vmatpush3.bf16.msra.mxu0 %v2164_v44  ;;  %2177 = vmatprep.subr.bf16.mxu1 %v2176_v31 }
 0x52f   :  { %2169 = vmatprep.subr.bf16.mxu0 %v2168_v47 }
 0x531   :  { %2179 = vmatpush3.bf16.msra.mxu1 %v2176_v31 }
 0x532   :  { %2171 = vmatpush3.bf16.msra.mxu0 %v2168_v47 }
 0x59a   :  { %v990_v38 = vpop.f32.mrb[6].mxu0 }
 0x59b   :  { %v2079_v39 = vpop.f32.mrb[7].mxu0 }
 0x5a2   :  { %v1066_v40 = vpop.f32.mrb[12].mxu1 }
 0x5a3   :  { %v2084_v41 = vpop.f32.mrb[13].mxu1 }
 0x5f3   :  { %v1218_v49 = vpop.f32.mrb[14].mxu1 }
 0x5f4   :  { %1530 = vrot.lane.b32.xlu1 %v1218_v49, %s2303_s19  ;;  %v2094_v50 = vpop.f32.mrb[15].mxu1 }
 0x5f5   :  { %v1806_v50 = vld [vmem:[%s2703_s7] sm:$0xff] }
 0x5f7   :  { %v1142_v51 = vpop.f32.mrb[8].mxu0 }
 0x5f8   :  { %1528 = vrot.lane.b32.xlu0 %v1142_v51, %s2303_s19  ;;  %v2089_v52 = vpop.f32.mrb[9].mxu0  ;;  %v1807_v51 = vld [vmem:[%s2703_s7 + $0x8] sm:$0xff] }
 0x5f9   :  { %v2180_v52 = vpack.c.bf16 %v1807_v51, %v1806_v50 }
 0x5fb   :  { %v1370_v53 = vpop.f32.mrb[16].mxu1  ;;  %2181 = vmatprep.subr.bf16.mxu0 %v2180_v52 }
 0x5fc   :  { %v1294_v54 = vpop.f32.mrb[10].mxu0  ;;  %1538 = vrot.lane.b32.xlu1 %v1370_v53, %s2311_s28  ;;  %v2104_v55 = vpop.f32.mrb[17].mxu1  ;;  %v1808_v53 = vld [vmem:[%s2703_s7 + $0x10] sm:$0xff] }
 0x5fd   :  { %1536 = vrot.lane.b32.xlu0 %v1294_v54, %s2311_s28  ;;  %v2099_v56 = vpop.f32.mrb[11].mxu0  ;;  %v1809_v54 = vld [vmem:[%s2703_s7 + $0x18] sm:$0xff] }
 0x5fe   :  { %v2184_v55 = vpack.c.bf16 %v1809_v54, %v1808_v53  ;;  %v1810_v56 = vld [vmem:[%s2703_s7 + $0x20] sm:$0xff] }
 0x5ff   :  { %v1522_v57 = vpop.f32.mrb[18].mxu1 }
 0x600   :  { %v1446_v58 = vpop.f32.mrb[12].mxu0  ;;  %1546 = vrot.lane.b32.xlu1 %v1522_v57, %s2312_s3  ;;  %v2114_v59 = vpop.f32.mrb[19].mxu1  ;;  %v1811_v57 = vld [vmem:[%s2703_s7 + $0x28] sm:$0xff] }
 0x601   :  { %1544 = vrot.lane.b32.xlu0 %v1446_v58, %s2312_s3  ;;  %v2109_v60 = vpop.f32.mrb[13].mxu0  ;;  %v2188_v58 = vpack.c.bf16 %v1811_v57, %v1810_v56  ;;  %v1812_v59 = vld [vmem:[%s2703_s7 + $0x30] sm:$0xff] }
 0x602   :  { %v1813_v60 = vld [vmem:[%s2703_s7 + $0x38] sm:$0xff] }
 0x666   :  { %v1531_v61 = vpop.permute.xlu1 %1530 }
 0x667   :  { %v1551_v3 = vsel %vm215_vm2, %v1066_v40, %v1531_v61  ;;  %v1956_v40 = vld [vmem:[%s2707_s11] ss:$0 sm:$0xff]  ;;  %v2192_v61 = vpack.c.bf16 %v1813_v60, %v1812_v59 }
 0x66a   :  { %v1529_v62 = vpop.permute.xlu0 %1528 }
 0x66b   :  { %v1550_v4 = vsel %vm215_vm2, %v990_v38, %v1529_v62  ;;  %v1958_v62 = vld [vmem:[%s2702_s6] ss:$0 sm:$0xff] }
 0x66e   :  { %v1539_v63 = vpop.permute.xlu1 %1538 }
 0x66f   :  { %v1537_v2 = vpop.permute.xlu0 %1536  ;;  %v1554_v5 = vsel %vm1552_vm3, %v1551_v3, %v1539_v63 }
 0x670   :  { %v1553_v7 = vsel %vm1552_vm3, %v1550_v4, %v1537_v2 }
 0x672   :  { %v1547_v6 = vpop.permute.xlu1 %1546 }
 0x673   :  { %v1557_v8 = vsel %vm1555_vm4, %v1554_v5, %v1547_v6  ;;  %v1545_v9 = vpop.permute.xlu0 %1544 }
 0x674   :  { %v1556_v10 = vsel %vm1555_vm4, %v1553_v7, %v1545_v9 }
 0x675   :  { %2123 = vmatprep.mubr.msk.f32.mxu0 %vm67_vm0, %v1556_v10 }
 0x676   :  { %2124 = vmatmul.mubr.msk.f32.vlgmr.msra.gmra.mrb[14].mxu0 %vm67_vm0, %v1557_v8 }
 0x677   :  { %2183 = vmatpush3.bf16.msra.mxu0 %v2180_v52 }
 0x678   :  { %2185 = vmatprep.subr.bf16.mxu0 %v2184_v55 }
 0x67b   :  { %2187 = vmatpush3.bf16.msra.mxu0 %v2184_v55 }
 0x67c   :  { %2189 = vmatprep.subr.bf16.mxu0 %v2188_v58 }
 0x67f   :  { %2191 = vmatpush3.bf16.msra.mxu0 %v2188_v58 }
 0x680   :  { %2193 = vmatprep.subr.bf16.mxu0 %v2192_v61 }
 0x683   :  { %2195 = vmatpush3.bf16.msra.mxu0 %v2192_v61 }
 0x749   :  { %v2125_v12 = vpop.f32.mrb[14].mxu0 }
 0x74a   :  { %v1647_v13 = vadd.f32 %v2125_v12, %v1953_v11  ;;  %v1641_v14 = vpop.f32.mrb[15].mxu0 }
 0x74b   :  { %v1642_v15 = vadd.f32 %v1953_v11, %v1641_v14 }
 0x74c   :  { %v2614_v16 = vadd.f32 %v1647_v13, %v2401_v1 }
 0x74d   :  { %v2617_v45 = vadd.f32 %v1642_v15, %v2399_v0 }
 0x74e   :  { %v1657_v48 = vsel %vm67_vm0, %v2614_v16, 0.0 }
 0x74f   :  { %1658 = vadd.xlane.f32.xlu1 %v1657_v48  ;;  %v1654_v17 = vsel %vm67_vm0, %v2617_v45, 0.0 }
 0x750   :  { %1655 = vadd.xlane.f32.xlu0 %v1654_v17 }
 0x7dc   :  { %v1659_v18 = vpop.xlane.xlu1 %1658 }
 0x7dd   :  { %v1661_v19 = vmul.f32 0.03125, %v1659_v18  ;;  %v1656_v20 = vpop.xlane.xlu0 %1655 }
 0x7de   :  { %v1660_v21 = vmul.f32 0.03125, %v1656_v20 }
 0x7df   :  { %v1663_v22 = vsub.f32 %v2614_v16, %v1661_v19 }
 0x7e0   :  { %v1662_v1 = vsub.f32 %v2617_v45, %v1660_v21 }
 0x7e1   :  { %v1665_v24 = vmul.f32 %v1663_v22, %v1663_v22 }
 0x7e2   :  { %v1664_v23 = vmul.f32 %v1662_v1, %v1662_v1 }
 0x7e3   :  { %v1669_v25 = vsel %vm67_vm0, %v1665_v24, 0.0 }
 0x7e4   :  { %v1666_v0 = vsel %vm67_vm0, %v1664_v23, 0.0 }
 0x7e5   :  { %1667 = vadd.xlane.f32.xlu0 %v1666_v0 }
 0x7e9   :  { %1670 = vadd.xlane.f32.xlu0 %v1669_v25 }
 0x872   :  { %v1668_v32 = vpop.xlane.xlu0 %1667 }
 0x873   :  { %v1672_v33 = vmul.f32 0.03125, %v1668_v32 }
 0x875   :  { %v1674_v34 = vadd.f32 1e-05, %v1672_v33 }
 0x876   :  { %v1671_v35 = vpop.xlane.xlu0 %1670 }
 0x877   :  { %2245 = vrsqrt.f32 %v1674_v34  ;;  %v1673_v36 = vmul.f32 0.03125, %v1671_v35 }
 0x879   :  { %v1675_v38 = vadd.f32 1e-05, %v1673_v36 }
 0x87b   :  { %2247 = vrsqrt.f32 %v1675_v38 }
 0x881   :  { %v2246_v39 = vpop.eup %2245 }
 0x882   :  { %v1678_v41 = vmul.f32 %v2246_v39, %v1662_v1  ;;  %v1961_v1 = vld [vmem:[%s2704_s8] ss:$0 sm:$0xff] }
 0x884   :  { %v1686_v43 = vmul.f32 %v1956_v40, %v1678_v41 }
 0x885   :  { %v2248_v44 = vpop.eup %2247 }
 0x886   :  { %v1679_v37 = vmul.f32 %v2248_v44, %v1663_v22  ;;  %v1694_v46 = vadd.f32 %v1957_v42, %v1686_v43 }
 0x888   :  { %v1687_v47 = vmul.f32 %v1956_v40, %v1679_v37  ;;  %2134 = vmatprep.mubr.msk.f32.mxu1 %vm67_vm0, %v1694_v46 }
 0x88a   :  { %v1695_v49 = vadd.f32 %v1957_v42, %v1687_v47 }
 0x88c   :  { %2135 = vmatmul.mubr.msk.f32.vlgmr.msra.gmra.mrb[20].mxu1 %vm67_vm0, %v1695_v49 }
 0x95f   :  { %v2136_v63 = vpop.f32.mrb[20].mxu1 }
 0x960   :  { %v1785_v2 = vadd.f32 %v2136_v63, %v1958_v62  ;;  %v1779_v3 = vpop.f32.mrb[21].mxu1 }
 0x961   :  { %v1780_v4 = vadd.f32 %v1958_v62, %v1779_v3 }
 0x962   :  { %v1791_v5 = vmul.f32 0.044715, %v1785_v2  ;;  %v1789_v20 = vmul.f32 0.5, %v1785_v2 }
 0x963   :  { %v1790_v6 = vmul.f32 0.044715, %v1780_v4  ;;  %v1788_v18 = vmul.f32 0.5, %v1780_v4 }
 0x964   :  { %v1793_v7 = vmul.f32 %v1791_v5, %v1785_v2 }
 0x965   :  { %v1792_v8 = vmul.f32 %v1790_v6, %v1780_v4 }
 0x966   :  { %v1795_v9 = vmul.f32 %v1793_v7, %v1785_v2 }
 0x967   :  { %v1794_v10 = vmul.f32 %v1792_v8, %v1780_v4 }
 0x968   :  { %v1797_v11 = vadd.f32 %v1795_v9, %v1785_v2 }
 0x969   :  { %v1796_v12 = vadd.f32 %v1794_v10, %v1780_v4 }
 0x96a   :  { %v1799_v13 = vmul.f32 0.7978846, %v1797_v11 }
 0x96b   :  { %v1798_v14 = vmul.f32 0.7978846, %v1796_v12 }
 0x96c   :  { %2249 = vtanh.f32 %v1799_v13 }
 0x96d   :  { %2251 = vtanh.f32 %v1798_v14 }
 0x976   :  { %v2250_v15 = vpop.eup %2249 }
 0x977   :  { %v2252_v48 = vpop.eup %2251  ;;  %v1803_v17 = vadd.f32 1.0, %v2250_v15 }
 0x978   :  { %v1802_v19 = vadd.f32 1.0, %v2252_v48 }
 0x979   :  { %v1805_v22 = vmul.f32 %v1803_v17, %v1789_v20 }
 0x97a   :  { %v1804_v21 = vmul.f32 %v1802_v19, %v1788_v18 }
 0x97c   :  { %2153 = vmatprep.mubr.msk.f32.mxu0 %vm1821_vm5, %v1804_v21 }
 0x97d   :  { %2154 = vmatmul.mubr.msk.f32.vlgmr.msra.gmra.mrb[16].mxu0 %vm1821_vm5, %v1805_v22 }
 0xa50   :  { %v2155_v23 = vpop.f32.mrb[16].mxu0 }
 0xa51   :  { %v1900_v0 = vadd.f32 %v2155_v23, %v1961_v1  ;;  %v1894_v24 = vpop.f32.mrb[17].mxu0 }
 0xa52   :  { %v1895_v25 = vadd.f32 %v1961_v1, %v1894_v24 }
 0xa53   :  { %v1904_v26 = vadd.f32 %v1900_v0, %v2614_v16 }
 0xa54   :  { %v1903_v27 = vadd.f32 %v1895_v25, %v2617_v45 }
 0xa55   :  { %1906 = vst.msk [vmem:[#allocation5 + $0x8] sm:$0xff] %vm67_vm0, %v1904_v26 }
 0xa56   :  { %1905 = vst.msk [vmem:[#allocation5] sm:$0xff] %vm67_vm0, %v1903_v27 }
 0xa57   :  { %2286 = shalt.err (!%p2283_p12)
}
 0xa58   :  { %s2287_s20 = scalar_lea.hbm %s2709_s13, 256 }
 0xa59   :  { %p2288_p13 = scmp.ne.s32.totalorder %s2709_s13, %s2287_s20  ;;  %p2291_p0 = scmp.lt.u32.totalorder %s2287_s20, %s2709_s13 }
 0xa5b   :  { %p2293_p1 = pnand %p2291_p0, %p2288_p13 }
 0xa5d   :  { %2296 = shalt.err (!%p2293_p1)
}
 0xa5e   :  { %1918 = dma.vmem_to_hbm [thread:$0]  %s1913_s2, 256, %s2709_s13, [#allocation4], %s2302_s18, %s2302_s18, %s2303_s19  }
 0xa5f   :  { %2299 = dma.done.wait [#allocation4], 256  }
 0xa60   :  { %2300 = vsyncadd [#allocation4], 4294967040 }
 0xa61   :  { %1922 = vsyncpa [#allocation3], 1 }
 0xa62   :  { %1923 = vsyncpa [#allocation4], 1 }

</bundles_post_ra>
